<compile_context>
chip_gen: v7x
topology: tpu7x:2x2x1
jax: 0.10.0
libtpu: 0.0.40
codegen_flags: <defaults>
</compile_context>

<pallas_src>
import jax
import jax.numpy as jnp
from jax.experimental import pallas as pl
from jax.experimental.pallas import tpu as pltpu


def _round_up(x, m):
    return (x + m - 1) // m * m


def _round_down(x, m):
    return x // m * m


def _vmem_budget_bytes():
    """~75% of physical VMEM: ~48 MiB on v7x (64 MiB parts), ~96 MiB on v5e/v6e."""
    try:
        cap = int(pltpu.get_tpu_info().vmem_capacity_bytes)
    except Exception:
        cap = 128 * 1024 * 1024
    return max(int(0.75 * cap), 32 * 1024 * 1024)


def _make_kernel(temperature: float, alpha: float, batch_size: int, tb: int):
    T = float(temperature)
    inv_T = 1.0 / T
    kd_w = float(alpha) * T * T     # weight on the per-row KL term (incl. T^2)
    ce_w = 1.0 - float(alpha)       # weight on the per-row CE term

    def kernel(s_ref, t_ref, lab_ref, o_ref):
        i = pl.program_id(0)

        s = s_ref[...].astype(jnp.float32)        # (TB, C)
        labels = lab_ref[...]                     # (TB, 1) int32
        TB, C = s.shape

        # ---- student row max (shared: max(s/T) == max(s)/T) ----
        s_max = jnp.max(s, axis=1, keepdims=True)
        s_scaled = s if T == 1.0 else s * inv_T
        s_max_T = s_max if T == 1.0 else s_max * inv_T

        # ---- teacher branch: fully consumed before the CE pass (fewer live temps) ----
        t = t_ref[...].astype(jnp.float32)
        t_shift = t * inv_T
        t_shift = t_shift - jnp.max(t_shift, axis=1, keepdims=True)
        t_exp = jnp.exp(t_shift)                               # ∝ teacher probs
        t_sum = jnp.sum(t_exp, axis=1, keepdims=True)          # Z_t  (TB, 1)
        #   sum_j p_j (log p_j - log q_j)
        # = (1/Z_t) sum_j t_exp_j (t_shift_j - s_scaled_j) + (lse(s/T) - log Z_t)
        # (underflowed t_exp_j == 0 contributes exactly 0 -> matches xlogy convention)
        kl_dot = jnp.sum(t_exp * (t_shift - s_scaled), axis=1, keepdims=True)
        # t, t_shift, t_exp dead past this point.

        # ---- student log-sum-exps (temperature-scaled and raw) ----
        if T == 1.0:
            e1 = jnp.exp(s - s_max)
            s_lse1 = jnp.log(jnp.sum(e1, axis=1, keepdims=True)) + s_max
            s_lse_T = s_lse1                         # same distribution at T == 1
        else:
            e_T = jnp.exp(s_scaled - s_max_T)
            s_lse_T = jnp.log(jnp.sum(e_T, axis=1, keepdims=True)) + s_max_T
            if T == 2.0:
                e1 = e_T * e_T                       # exp(s - max) via VALU square
            else:
                e1 = jnp.exp(s - s_max)
            s_lse1 = jnp.log(jnp.sum(e1, axis=1, keepdims=True)) + s_max

        # ---- cross-entropy:  lse(s) - s[label]  (select, no onehot cast+mul) ----
        class_ids = jax.lax.broadcasted_iota(jnp.int32, (TB, C), 1)
        label_logit = jnp.sum(jnp.where(class_ids == labels, s, 0.0),
                              axis=1, keepdims=True)

        kl_rows = kl_dot / t_sum + (s_lse_T - jnp.log(t_sum))     # (TB, 1)
        ce_rows = s_lse1 - label_logit                            # (TB, 1)
        combined = kd_w * kl_rows + ce_w * ce_rows                # (TB, 1)

        # Ragged last block: OOB tail rows hold garbage (possibly Inf/NaN after
        # exp) -> select-mask (NOT multiply) before the single fused reduction.
        row_ids = jax.lax.broadcasted_iota(jnp.int32, (TB, 1), 0) + i * tb
        combined = jnp.where(row_ids < batch_size, combined, 0.0)

        o_ref[0, 0] = jnp.sum(combined)

    return kernel


def distillation_loss(student_logits, teacher_logits, labels,
                      temperature=3.0, alpha=0.5, block_b=1024):
    """Pallas implementation of DistillationLoss.forward. Returns a scalar f32.

    Pass logits in their native dtype (bf16 stays bf16 over HBM); the kernel
    upcasts to f32 internally.
    """
    B, C = student_logits.shape
    itemsize = jnp.dtype(student_logits.dtype).itemsize
    budget = _vmem_budget_bytes()

    # Per-row VMEM bytes: 2 logit inputs x 2 pipeline buffers (native dtype)
    # + ~6 simultaneously-live (TB, C) f32 temporaries; keep 2x headroom for
    # Mosaic internal scratch.  Round rows to 16 (covers f32 and bf16 tiling).
    per_row = 2 * 2 * C * itemsize + 6 * C * 4
    tb_cap = max(_round_down(budget // (2 * per_row), 16), 16)
    TB = max(16, min(_round_up(block_b, 16), _round_up(B, 16), tb_cap))
    nb = pl.cdiv(B, TB)

    # Only the tiny labels vector is padded; the (B, C) logit matrices stream
    # unpadded (ragged last block is masked inside the kernel).
    Bp = nb * TB
    labels = labels.astype(jnp.int32)
    if Bp != B:
        labels = jnp.pad(labels, ((0, Bp - B),))
    labels2d = labels.reshape(Bp, 1)

    cost = pl.CostEstimate(
        flops=15 * B * C,
        transcendentals=3 * B * C,
        bytes_accessed=2 * B * C * itemsize + B * 4 + nb * 4,
    )

    kernel = _make_kernel(temperature, alpha, B, TB)

    partials = pl.pallas_call(
        kernel,
        out_shape=jax.ShapeDtypeStruct((nb, 1), jnp.float32),
        grid_spec=pltpu.PrefetchScalarGridSpec(
            num_scalar_prefetch=0,
            grid=(nb,),
            in_specs=[
                pl.BlockSpec((TB, C), lambda i: (i, 0)),
                pl.BlockSpec((TB, C), lambda i: (i, 0)),
                pl.BlockSpec((TB, 1), lambda i: (i, 0)),
            ],
            out_specs=pl.BlockSpec((1, 1), lambda i: (i, 0),
                                   memory_space=pltpu.MemorySpace.SMEM),
        ),
        compiler_params=pltpu.CompilerParams(
            dimension_semantics=("parallel",),   # independent per-block partials
            vmem_limit_bytes=budget,
        ),
        cost_estimate=cost,
    )(student_logits, teacher_logits, labels2d)

    # nb tiny floats: final sum, batch-mean normalization in the wrapper.
    return jnp.sum(partials) / jnp.float32(B)


def _reference(student_logits, teacher_logits, labels, temperature=3.0, alpha=0.5):
    s = student_logits.astype(jnp.float32)
    t = teacher_logits.astype(jnp.float32)
    B = s.shape[0]
    t_probs = jax.nn.softmax(t / temperature, axis=1)
    s_logprobs_T = jax.nn.log_softmax(s / temperature, axis=1)
    kl_terms = jnp.where(
        t_probs > 0,
        t_probs * (jnp.log(jnp.where(t_probs > 0, t_probs, 1.0)) - s_logprobs_T),
        0.0)
    distill = (jnp.sum(kl_terms) / B) * temperature ** 2
    s_logprobs = jax.nn.log_softmax(s, axis=1)
    ce = -jnp.mean(jnp.take_along_axis(s_logprobs, labels[:, None], axis=1))
    return alpha * distill + (1 - alpha) * ce


if __name__ == "__main__":
    key = jax.random.PRNGKey(0)
    k1, k2, k3 = jax.random.split(key, 3)

    B, C = 40, 24  # small synthetic shapes: batch=40, num_classes=24
    student = jax.random.normal(k1, (B, C), dtype=jnp.float32) * 2.0
    teacher = jax.random.normal(k2, (B, C), dtype=jnp.float32) * 2.0
    labels = jax.random.randint(k3, (B,), 0, C, dtype=jnp.int32)

    ref = _reference(student, teacher, labels, temperature=3.0, alpha=0.5)

    # Default path: TB sized from the VMEM budget -> single ragged block (40 rows in a 48-row tile).
    loss = jax.block_until_ready(
        distillation_loss(student, teacher, labels, temperature=3.0, alpha=0.5))
    assert jnp.allclose(loss, ref, rtol=1e-5, atol=1e-5), (loss, ref)

    # Multi-block path: grid of 3 blocks, last one partially masked, no logit padding.
    loss_tiled = jax.block_until_ready(
        distillation_loss(student, teacher, labels, temperature=3.0, alpha=0.5, block_b=16))
    assert jnp.allclose(loss_tiled, ref, rtol=1e-5, atol=1e-5), (loss_tiled, ref)

    # Temperature special cases (T == 1 reuses the raw exp pass, T == 2 squares it).
    for T in (1.0, 2.0):
        refT = _reference(student, teacher, labels, temperature=T, alpha=0.5)
        outT = jax.block_until_ready(
            distillation_loss(student, teacher, labels, temperature=T, alpha=0.5))
        assert jnp.allclose(outT, refT, rtol=1e-5, atol=1e-5), (T, outT, refT)

    # bf16-over-the-wire path (halves HBM bytes; f32 cast happens inside the kernel).
    s_bf, t_bf = student.astype(jnp.bfloat16), teacher.astype(jnp.bfloat16)
    ref_bf = _reference(s_bf, t_bf, labels, temperature=3.0, alpha=0.5)
    out_bf = jax.block_until_ready(
        distillation_loss(s_bf, t_bf, labels, temperature=3.0, alpha=0.5))
    assert jnp.allclose(out_bf, ref_bf, rtol=1e-5, atol=1e-5), (out_bf, ref_bf)

    print("KERNEL_OK")
</pallas_src>

<mosaic_0001>
module attributes {stable_mosaic.version = 11 : i64} {
  func.func @kernel(%arg0: i32, %arg1: memref<48x24xf32, #tpu.memory_space<vmem>>, %arg2: memref<48x24xf32, #tpu.memory_space<vmem>>, %arg3: memref<48x1xi32, #tpu.memory_space<vmem>>, %arg4: memref<1x1xf32, #tpu.memory_space<smem>>) attributes {dimension_semantics = [#tpu.dimension_semantics<parallel>], iteration_bounds = array<i64: 1>, scalar_prefetch = 0 : i64, scratch_operands = 0 : i64, tpu.core_type = #tpu.core_type<tc>, window_params = [{transform_indices = @transform_0, window_bounds = array<i64: 48, 24>}, {transform_indices = @transform_1, window_bounds = array<i64: 48, 24>}, {transform_indices = @transform_2, window_bounds = array<i64: 48, 1>}, {transform_indices = @transform_3, window_bounds = array<i64: 1, 1>}]} {
    %c0 = arith.constant 0 : index
    %c0_0 = arith.constant 0 : index
    %0 = vector.load %arg1[%c0, %c0_0] : memref<48x24xf32, #tpu.memory_space<vmem>>, vector<48x24xf32>
    %c0_1 = arith.constant 0 : index
    %c0_2 = arith.constant 0 : index
    %1 = vector.load %arg3[%c0_1, %c0_2] : memref<48x1xi32, #tpu.memory_space<vmem>>, vector<48x1xi32>
    %cst = arith.constant dense<0xFF800000> : vector<48xf32>
    %2 = vector.multi_reduction <maximumf>, %0, %cst [1] : vector<48x24xf32> to vector<48xf32>
    %3 = vector.shape_cast %2 : vector<48xf32> to vector<48x1xf32>
    %cst_3 = arith.constant 0.333333343 : f32
    %4 = vector.broadcast %cst_3 : f32 to vector<48x24xf32>
    %5 = arith.mulf %0, %4 : vector<48x24xf32>
    %cst_4 = arith.constant 0.333333343 : f32
    %6 = vector.broadcast %cst_4 : f32 to vector<48x1xf32>
    %7 = arith.mulf %3, %6 : vector<48x1xf32>
    %c0_5 = arith.constant 0 : index
    %c0_6 = arith.constant 0 : index
    %8 = vector.load %arg2[%c0_5, %c0_6] : memref<48x24xf32, #tpu.memory_space<vmem>>, vector<48x24xf32>
    %cst_7 = arith.constant 0.333333343 : f32
    %9 = vector.broadcast %cst_7 : f32 to vector<48x24xf32>
    %10 = arith.mulf %8, %9 : vector<48x24xf32>
    %cst_8 = arith.constant dense<0xFF800000> : vector<48xf32>
    %11 = vector.multi_reduction <maximumf>, %10, %cst_8 [1] : vector<48x24xf32> to vector<48xf32>
    %12 = vector.shape_cast %11 : vector<48xf32> to vector<48x1xf32>
    %13 = vector.broadcast %12 : vector<48x1xf32> to vector<48x24xf32>
    %14 = arith.subf %10, %13 : vector<48x24xf32>
    %15 = math.exp %14 : vector<48x24xf32>
    %cst_9 = arith.constant dense<0.000000e+00> : vector<48xf32>
    %16 = vector.multi_reduction <add>, %15, %cst_9 [1] : vector<48x24xf32> to vector<48xf32>
    %17 = vector.shape_cast %16 : vector<48xf32> to vector<48x1xf32>
    %18 = arith.subf %14, %5 : vector<48x24xf32>
    %19 = arith.mulf %15, %18 : vector<48x24xf32>
    %cst_10 = arith.constant dense<0.000000e+00> : vector<48xf32>
    %20 = vector.multi_reduction <add>, %19, %cst_10 [1] : vector<48x24xf32> to vector<48xf32>
    %21 = vector.shape_cast %20 : vector<48xf32> to vector<48x1xf32>
    %22 = vector.broadcast %7 : vector<48x1xf32> to vector<48x24xf32>
    %23 = arith.subf %5, %22 : vector<48x24xf32>
    %24 = math.exp %23 : vector<48x24xf32>
    %cst_11 = arith.constant dense<0.000000e+00> : vector<48xf32>
    %25 = vector.multi_reduction <add>, %24, %cst_11 [1] : vector<48x24xf32> to vector<48xf32>
    %26 = vector.shape_cast %25 : vector<48xf32> to vector<48x1xf32>
    %27 = math.log %26 : vector<48x1xf32>
    %28 = arith.addf %27, %7 : vector<48x1xf32>
    %29 = vector.broadcast %3 : vector<48x1xf32> to vector<48x24xf32>
    %30 = arith.subf %0, %29 : vector<48x24xf32>
    %31 = math.exp %30 : vector<48x24xf32>
    %cst_12 = arith.constant dense<0.000000e+00> : vector<48xf32>
    %32 = vector.multi_reduction <add>, %31, %cst_12 [1] : vector<48x24xf32> to vector<48xf32>
    %33 = vector.shape_cast %32 : vector<48xf32> to vector<48x1xf32>
    %34 = math.log %33 : vector<48x1xf32>
    %35 = arith.addf %34, %3 : vector<48x1xf32>
    %36 = tpu.iota {dimensions = array<i32: 1>} : vector<48x24xi32>
    %37 = vector.broadcast %1 : vector<48x1xi32> to vector<48x24xi32>
    %38 = arith.cmpi eq, %36, %37 : vector<48x24xi32>
    %cst_13 = arith.constant 0.000000e+00 : f32
    %39 = vector.broadcast %cst_13 : f32 to vector<48x24xf32>
    %40 = arith.select %38, %0, %39 : vector<48x24xi1>, vector<48x24xf32>
    %cst_14 = arith.constant dense<0.000000e+00> : vector<48xf32>
    %41 = vector.multi_reduction <add>, %40, %cst_14 [1] : vector<48x24xf32> to vector<48xf32>
    %42 = vector.shape_cast %41 : vector<48xf32> to vector<48x1xf32>
    %43 = arith.divf %21, %17 : vector<48x1xf32>
    %44 = math.log %17 : vector<48x1xf32>
    %45 = arith.subf %28, %44 : vector<48x1xf32>
    %46 = arith.addf %43, %45 : vector<48x1xf32>
    %47 = arith.subf %35, %42 : vector<48x1xf32>
    %cst_15 = arith.constant 4.500000e+00 : f32
    %48 = vector.broadcast %cst_15 : f32 to vector<48x1xf32>
    %49 = arith.mulf %48, %46 : vector<48x1xf32>
    %cst_16 = arith.constant 5.000000e-01 : f32
    %50 = vector.broadcast %cst_16 : f32 to vector<48x1xf32>
    %51 = arith.mulf %50, %47 : vector<48x1xf32>
    %52 = arith.addf %49, %51 : vector<48x1xf32>
    %53 = tpu.iota {dimensions = array<i32: 0>} : vector<48x1xi32>
    %c48_i32 = arith.constant 48 : i32
    %54 = arith.muli %arg0, %c48_i32 : i32
    %55 = vector.broadcast %54 : i32 to vector<48x1xi32>
    %56 = arith.addi %53, %55 : vector<48x1xi32>
    %c40_i32 = arith.constant 40 : i32
    %57 = vector.broadcast %c40_i32 : i32 to vector<48x1xi32>
    %58 = arith.cmpi slt, %56, %57 : vector<48x1xi32>
    %cst_17 = arith.constant 0.000000e+00 : f32
    %59 = vector.broadcast %cst_17 : f32 to vector<48x1xf32>
    %60 = arith.select %58, %52, %59 : vector<48x1xi1>, vector<48x1xf32>
    %61 = vector.shape_cast %60 : vector<48x1xf32> to vector<1x48x1xf32>
    %cst_18 = arith.constant dense<0.000000e+00> : vector<1xf32>
    %62 = vector.multi_reduction <add>, %61, %cst_18 [1, 2] : vector<1x48x1xf32> to vector<1xf32>
    %63 = vector.shape_cast %62 : vector<1xf32> to vector<1x1x1xf32>
    %64 = vector.extract %63[0, 0, 0] : f32 from vector<1x1x1xf32>
    %c0_19 = arith.constant 0 : index
    %c0_20 = arith.constant 0 : index
    %65 = memref.load %arg4[%c0_19, %c0_20] : memref<1x1xf32, #tpu.memory_space<smem>>
    memref.store %64, %arg4[%c0_19, %c0_20] : memref<1x1xf32, #tpu.memory_space<smem>>
    return
  }
  func.func @transform_0(%arg0: i32) -> (i32, i32) {
    %c0_i32 = arith.constant 0 : i32
    %c0_i32_0 = arith.constant 0 : i32
    return %arg0, %c0_i32 : i32, i32
  }
  func.func @transform_1(%arg0: i32) -> (i32, i32) {
    %c0_i32 = arith.constant 0 : i32
    %c0_i32_0 = arith.constant 0 : i32
    return %arg0, %c0_i32 : i32, i32
  }
  func.func @transform_2(%arg0: i32) -> (i32, i32) {
    %c0_i32 = arith.constant 0 : i32
    %c0_i32_0 = arith.constant 0 : i32
    return %arg0, %c0_i32 : i32, i32
  }
  func.func @transform_3(%arg0: i32) -> (i32, i32) {
    %c0_i32 = arith.constant 0 : i32
    %c0_i32_0 = arith.constant 0 : i32
    return %arg0, %c0_i32 : i32, i32
  }
}

</mosaic_0001>

<bundles_post_ra>
// kernel: tpu_custom_call.1
= control target key start
LH: loop header
LB: loop body
LE: loop exit
PB: predicated region body
PF: predicated region fallthrough
CT: control target
= control target key end

     0   :  { %8 = vsyncpa [#allocation3], 0  ;;  %s912_s0 = inlined_call_operand.hbm [shape: f32[40,24], index: 0, kind: input, shape index: {}]   ;;  %s913_s1 = inlined_call_operand.hbm [shape: f32[40,24], index: 1, kind: input, shape index: {}]   ;;  %s914_s2 = inlined_call_operand.hbm [shape: s32[48,1], index: 2, kind: input, shape index: {}]   ;;  %s915_s3 = inlined_call_operand.hbm [shape: f32[1,1], index: 3, kind: output, shape index: {}]  }
   0x1   :  { %9 = vsyncpa [#allocation6], 0 }
   0x2   :  { %10 = vsyncpa [#allocation4], 0 }
   0x3   :  { %15 = vsyncadd [#allocation3], 128  ;;  %s641_s12 = smov [#allocation2]   ;;  %s559_s16 = scalar_lea.hbm %s912_s0, 640 }
   0x4   :  { %s16_s13 = sshll.u32 %s641_s12, 4  ;;  %p560_p0 = scmp.ne.s32.totalorder %s912_s0, %s559_s16  ;;  %s17_s13 = int_to_ptr.vmem [resolvable:$true] %s16_s13 }
   0x5   :  { %p563_p1 = scmp.lt.u32.totalorder %s559_s16, %s912_s0 }
   0x7   :  { %p565_p2 = pnand %p563_p1, %p560_p0 }
   0x9   :  { %568 = shalt.err (!%p565_p2)
}
   0xa   :  { %s569_s21 = scalar_lea.vmem %s17_s13, 640  ;;  %s573_s22 = scalar_lea.vmem %s17_s13, 768 }
   0xb   :  { %p570_p3 = scmp.ne.s32.totalorder %s17_s13, %s569_s21  ;;  %p574_p4 = scmp.lt.s32.totalorder %s17_s13, %s17_s13 }
   0xc   :  { %p575_p5 = scmp.lt.s32.totalorder %s573_s22, %s569_s21 }
   0xe   :  { %p576_p6 = por %p575_p5, %p574_p4 }
  0x10   :  { %p577_p7 = pnand %p576_p6, %p570_p3 }
  0x12   :  { %580 = shalt.err (!%p577_p7)
}
  0x13   :  { %s642_s23 = smov 128   ;;  %s643_s24 = smov 8  }
  0x14   :  { %22 = dma.hbm_to_vmem [thread:$0]  %s912_s0, 640, %s17_s13, [#allocation3], %s642_s23, %s642_s23, %s643_s24  }
  0x15   :  { %27 = vsyncadd [#allocation6], 128  ;;  %s644_s27 = smov [#allocation5]   ;;  %s645_s29 = smov [#allocation7]  }
  0x16   :  { %s28_s28 = sshll.u32 %s644_s27, 4  ;;  %s40_s30 = sshll.u32 %s645_s29, 4  ;;  %s29_s28 = int_to_ptr.vmem [resolvable:$true] %s28_s28  ;;  %s683_s30 = int_to_ptr.vmem [resolvable:$true] %s40_s30 }
  0x17   :  { %s581_s6 = scalar_lea.hbm %s913_s1, 640 }
  0x18   :  { %p582_p8 = scmp.ne.s32.totalorder %s913_s1, %s581_s6  ;;  %p585_p9 = scmp.lt.u32.totalorder %s581_s6, %s913_s1 }
  0x1a   :  { %p587_p10 = pnand %p585_p9, %p582_p8 }
  0x1c   :  { %590 = shalt.err (!%p587_p10)
}
  0x1d   :  { %s591_s0 = scalar_lea.vmem %s29_s28, 640  ;;  %s595_s11 = scalar_lea.vmem %s29_s28, 768 }
  0x1e   :  { %p592_p11 = scmp.ne.s32.totalorder %s29_s28, %s591_s0  ;;  %p596_p12 = scmp.lt.s32.totalorder %s29_s28, %s29_s28 }
  0x1f   :  { %p597_p13 = scmp.lt.s32.totalorder %s595_s11, %s591_s0 }
  0x21   :  { %p598_p0 = por %p597_p13, %p596_p12 }
  0x23   :  { %p599_p1 = pnand %p598_p0, %p592_p11 }
  0x25   :  { %602 = shalt.err (!%p599_p1)
}
  0x26   :  { %34 = dma.hbm_to_vmem [thread:$0]  %s913_s1, 640, %s29_s28, [#allocation6], %s642_s23, %s642_s23, %s643_s24  }
  0x27   :  { %s603_s16 = scalar_lea.hbm %s914_s2, 768 }
  0x28   :  { %p604_p2 = scmp.ne.s32.totalorder %s914_s2, %s603_s16  ;;  %p607_p3 = scmp.lt.u32.totalorder %s603_s16, %s914_s2 }
  0x2a   :  { %p609_p4 = pnand %p607_p3, %p604_p2 }
  0x2c   :  { %612 = shalt.err (!%p609_p4)
}
  0x2d   :  { %s613_s21 = scalar_lea.vmem %s683_s30, 768  ;;  %p618_p6 = scmp.lt.s32.totalorder %s683_s30, %s683_s30 }
  0x2e   :  { %p614_p5 = scmp.ne.s32.totalorder %s683_s30, %s613_s21  ;;  %p619_p7 = scmp.lt.s32.totalorder %s613_s21, %s613_s21 }
  0x30   :  { %p620_p8 = por %p619_p7, %p618_p6 }
  0x32   :  { %p621_p9 = pnand %p620_p8, %p614_p5 }
  0x34   :  { %624 = shalt.err (!%p621_p9)
}
  0x35   :  { %46 = dma.hbm_to_vmem [thread:$0]  %s914_s2, 768, %s683_s30, [#allocation6], %s642_s23, %s642_s23, %s643_s24  }
  0x36   :  { %635 = dma.done.wait [#allocation3], 768  }
  0x37   :  { %636 = vsyncadd [#allocation3], 4294966528 }
  0x38   :  { %637 = dma.done.wait [#allocation6], 1536  }
  0x39   :  { %638 = vsyncadd [#allocation6], 4294965760  ;;  %v646_v0 = vmov 0   ;;  %vm68_vm0 = vcmask 195584   ;;  %v720_v1 = vld [vmem:[#allocation2 + $0x10] sm:$0xff]  ;;  %v722_v2 = vld [vmem:[#allocation2] sm:$0xff] }
  0x3a   :  { %488 = vset.pattern.permute.xlu1 %v646_v0  ;;  %487 = vset.pattern.permute.xlu0 %v646_v0  ;;  %v724_v3 = vld [vmem:[#allocation2 + $0x18] sm:$0xff]  ;;  %v75_v4 = vsel %vm68_vm0, %v720_v1, -inf  ;;  %v69_v5 = vsel %vm68_vm0, %v722_v2, -inf  ;;  %v730_v6 = vld [vmem:[#allocation2 + $0x8] sm:$0xff]  ;;  %v99_v8 = vld [vmem:[#allocation5] sm:$0xff]  ;;  %vm440_vm6 = vcmask 7168  }
  0x3b   :  { %v100_v7 = vld [vmem:[#allocation5 + $0x8] sm:$0xff]  ;;  %76 = vmax.xlane.f32.xlu1 %v75_v4  ;;  %70 = vmax.xlane.f32.xlu0 %v69_v5  ;;  %v78_v9 = vsel %vm68_vm0, %v724_v3, -inf  ;;  %v72_v10 = vsel %vm68_vm0, %v730_v6, -inf  ;;  %v738_v12 = vmul.f32 0.33333334, %v99_v8  ;;  %v101_v13 = vld [vmem:[#allocation5 + $0x10] sm:$0xff] }
  0x3c   :  { %v736_v11 = vmul.f32 0.33333334, %v100_v7  ;;  %v107_v16 = vmul.f32 0.33333334, %v101_v13  ;;  %v744_v17 = vld [vmem:[#allocation2 + $0x20] sm:$0xff]  ;;  %v103_v18 = vld [vmem:[#allocation5 + $0x20] sm:$0xff]  ;;  %v303_v7 = vlaneseq }
  0x3d   :  { %v111_v15 = vsel %vm68_vm0, %v738_v12, -inf  ;;  %v102_v19 = vld [vmem:[#allocation5 + $0x18] sm:$0xff]  ;;  %v81_v21 = vsel %vm68_vm0, %v744_v17, -inf  ;;  %v749_v22 = vmul.f32 0.33333334, %v103_v18  ;;  %v64_v27 = vld [vmem:[#allocation7 + $0x10] sm:$0xff] }
  0x3e   :  { %v114_v14 = vsel %vm68_vm0, %v736_v11, -inf  ;;  %v117_v20 = vsel %vm68_vm0, %v107_v16, -inf  ;;  %v751_v23 = vmul.f32 0.33333334, %v102_v19  ;;  %v63_v26 = vld [vmem:[#allocation7 + $0x8] sm:$0xff]  ;;  %v62_v28 = vld [vmem:[#allocation7] sm:$0xff] }
  0x3f   :  { %79 = vmax.xlane.f32.xlu1 %v78_v9  ;;  %73 = vmax.xlane.f32.xlu0 %v72_v10  ;;  %v123_v24 = vsel %vm68_vm0, %v749_v22, -inf  ;;  %v65_v29 = vld [vmem:[#allocation7 + $0x18] sm:$0xff]  ;;  %v66_v30 = vld [vmem:[#allocation7 + $0x20] sm:$0xff]  ;;  %v766_v37 = vmul.f32 0.33333334, %v730_v6  ;;  %v820_v19 = vand.u32 127, %v303_v7 }
  0x40   :  { %v120_v25 = vsel %vm68_vm0, %v751_v23, -inf  ;;  %v785_v48 = vmul.f32 0.33333334, %v722_v2  ;;  %v792_v54 = vmul.f32 0.33333334, %v744_v17  ;;  %s625_s25 = scalar_lea.hbm %s915_s3, 16 }
  0x41   :  { %p626_p10 = scmp.ne.s32.totalorder %s915_s3, %s625_s25  ;;  %p629_p11 = scmp.lt.u32.totalorder %s625_s25, %s915_s3 }
  0x43   :  { %115 = vmax.xlane.f32.xlu1 %v114_v14  ;;  %112 = vmax.xlane.f32.xlu0 %v111_v15  ;;  %v817_v15 = vmul.f32 0.33333334, %v720_v1  ;;  %p631_p12 = pnand %p629_p11, %p626_p10 }
  0x47   :  { %118 = vmax.xlane.f32.xlu1 %v117_v20  ;;  %82 = vmax.xlane.f32.xlu0 %v81_v21 }
  0x4b   :  { %124 = vmax.xlane.f32.xlu1 %v123_v24  ;;  %121 = vmax.xlane.f32.xlu0 %v120_v25 }
  0x5c   :  { %309 = vperm.xlu1 %488, %v63_v26  }
  0x60   :  { %312 = vperm.xlu1 %488, %v64_v27  }
  0x61   :  { %306 = vperm.xlu0 %487, %v62_v28   ;;  %v833_v28 = vmul.f32 0.33333334, %v724_v3 }
  0x64   :  { %315 = vperm.xlu1 %488, %v65_v29  }
  0x68   :  { %318 = vperm.xlu1 %488, %v66_v30  }
  0xc8   :  { %v757_v31 = vpop.xlane.xlu1 %76  ;;  %v759_v32 = vpop.xlane.xlu0 %70 }
  0xc9   :  { %v251_v33 = vsub.f32 %v720_v1, %v757_v31  ;;  %v249_v34 = vsub.f32 %v722_v2, %v759_v32  ;;  %v782_v45 = vmul.f32 0.33333334, %v759_v32  ;;  %v814_v14 = vmul.f32 0.33333334, %v757_v31 }
  0xcb   :  { %v259_v35 = vmul.f32 1.442695, %v251_v33  ;;  %v255_v36 = vmul.f32 1.442695, %v249_v34  ;;  %v195_v51 = vsub.f32 %v785_v48, %v782_v45  ;;  %v197_v27 = vsub.f32 %v817_v15, %v814_v14 }
  0xcc   :  { %v768_v38 = vpop.xlane.xlu1 %79  ;;  %v770_v39 = vpop.xlane.xlu0 %73 }
  0xcd   :  { %489 = vpow2.f32 %v259_v35  ;;  %v252_v40 = vsub.f32 %v724_v3, %v768_v38  ;;  %v775_v41 = vmul.f32 0.33333334, %v770_v39  ;;  %v250_v42 = vsub.f32 %v730_v6, %v770_v39 }
  0xce   :  { %491 = vpow2.f32 %v255_v36  ;;  %v201_v63 = vmul.f32 1.442695, %v195_v51  ;;  %v828_v26 = vmul.f32 0.33333334, %v768_v38  ;;  %v205_v34 = vmul.f32 1.442695, %v197_v27 }
  0xcf   :  { %v261_v43 = vmul.f32 1.442695, %v252_v40  ;;  %v196_v44 = vsub.f32 %v766_v37, %v775_v41  ;;  %v257_v46 = vmul.f32 1.442695, %v250_v42 }
  0xd0   :  { %v116_v47 = vpop.xlane.xlu1 %115  ;;  %v113_v49 = vpop.xlane.xlu0 %112  ;;  %v198_v35 = vsub.f32 %v833_v28, %v828_v26 }
  0xd1   :  { %493 = vpow2.f32 %v261_v43  ;;  %v203_v50 = vmul.f32 1.442695, %v196_v44  ;;  %v802_v59 = vsub.f32 %v738_v12, %v113_v49  ;;  %v823_v21 = vsub.f32 %v736_v11, %v116_v47 }
  0xd2   :  { %495 = vpow2.f32 %v257_v46  ;;  %v207_v47 = vmul.f32 1.442695, %v198_v35 }
  0xd3   :  { %497 = vpow2.f32 %v203_v50  ;;  %v135_v10 = vmul.f32 1.442695, %v802_v59  ;;  %v137_v29 = vmul.f32 1.442695, %v823_v21 }
  0xd4   :  { %v119_v52 = vpop.xlane.xlu1 %118  ;;  %v789_v53 = vpop.xlane.xlu0 %82 }
  0xd5   :  { %v794_v55 = vsub.f32 %v107_v16, %v119_v52  ;;  %v797_v56 = vmul.f32 0.33333334, %v789_v53  ;;  %v253_v57 = vsub.f32 %v744_v17, %v789_v53 }
  0xd7   :  { %v490_v58 = vpop.eup %489  ;;  %v139_v60 = vmul.f32 1.442695, %v794_v55  ;;  %v263_v61 = vmul.f32 1.442695, %v253_v57  ;;  %v199_v4 = vsub.f32 %v792_v54, %v797_v56 }
  0xd8   :  { %v492_v62 = vpop.eup %491  ;;  %v125_v0 = vpop.xlane.xlu1 %124  ;;  %v273_v12 = vsel %vm68_vm0, %v490_v58, 0.0 }
  0xd9   :  { %499 = vpow2.f32 %v139_v60  ;;  %v267_v5 = vsel %vm68_vm0, %v492_v62, 0.0  ;;  %v809_v8 = vsub.f32 %v749_v22, %v125_v0  ;;  %v209_v16 = vmul.f32 1.442695, %v199_v4  ;;  %v122_v42 = vpop.xlane.xlu0 %121 }
  0xda   :  { %501 = vpow2.f32 %v263_v61  ;;  %268 = vadd.xlane.f32.xlu0 %v267_v5  ;;  %v132_v49 = vsub.f32 %v751_v23, %v122_v42  ;;  %v165_v5 = vsub.f32 %v802_v59, %v785_v48 }
  0xdb   :  { %v494_v9 = vpop.eup %493  ;;  %503 = vpow2.f32 %v201_v63  ;;  %v143_v22 = vmul.f32 1.442695, %v809_v8 }
  0xdc   :  { %v496_v13 = vpop.eup %495  ;;  %v310_v24 = vpop.permute.xlu1 %309  ;;  %505 = vpow2.f32 %v135_v10  ;;  %v276_v25 = vsel %vm68_vm0, %v494_v9, 0.0  ;;  %v141_v57 = vmul.f32 1.442695, %v132_v49  ;;  %v167_v9 = vsub.f32 %v794_v55, %v817_v15 }
  0xdd   :  { %v270_v18 = vsel %vm68_vm0, %v496_v13, 0.0  ;;  %v498_v20 = vpop.eup %497  ;;  %507 = vpow2.f32 %v209_v16  ;;  %vm324_vm1 = vcmp.eq.s32.totalorder %v820_v19, %v310_v24 }
  0xde   :  { %274 = vadd.xlane.f32.xlu0 %v273_v12  ;;  %271 = vadd.xlane.f32.xlu1 %v270_v18  ;;  %v216_v11 = vsel %vm68_vm0, %v498_v20, 0.0  ;;  %509 = vpow2.f32 %v143_v22  ;;  %v330_v40 = vsel %vm324_vm1, %v730_v6, 0.0  ;;  %v166_v22 = vsub.f32 %v823_v21, %v766_v37 }
  0xdf   :  { %511 = vpow2.f32 %v137_v29  ;;  %v338_v46 = vsel %vm68_vm0, %v330_v40, 0.0 }
  0xe0   :  { %513 = vpow2.f32 %v205_v34  ;;  %v313_v58 = vpop.permute.xlu1 %312 }
  0xe1   :  { %515 = vpow2.f32 %v207_v47  ;;  %vm325_vm2 = vcmp.eq.s32.totalorder %v820_v19, %v313_v58 }
  0xe2   :  { %217 = vadd.xlane.f32.xlu0 %v216_v11  ;;  %277 = vadd.xlane.f32.xlu1 %v276_v25  ;;  %517 = vpow2.f32 %v141_v57  ;;  %v331_v63 = vsel %vm325_vm2, %v720_v1, 0.0  ;;  %v307_v1 = vpop.permute.xlu0 %306  ;;  %v168_v11 = vsub.f32 %v132_v49, %v833_v28 }
  0xe3   :  { %v500_v30 = vpop.eup %499  ;;  %v341_v7 = vsel %vm68_vm0, %v331_v63, 0.0  ;;  %vm323_vm3 = vcmp.eq.s32.totalorder %v820_v19, %v307_v1 }
  0xe4   :  { %v502_v33 = vpop.eup %501  ;;  %v153_v36 = vsel %vm68_vm0, %v500_v30, 0.0  ;;  %v173_v20 = vmul.f32 %v500_v30, %v167_v9  ;;  %v316_v59 = vpop.permute.xlu1 %315  ;;  %v329_v15 = vsel %vm323_vm3, %v722_v2, 0.0  ;;  %v169_v2 = vsub.f32 %v809_v8, %v792_v54 }
  0xe5   :  { %v279_v43 = vsel %vm68_vm0, %v502_v33, 0.0  ;;  %v504_v44 = vpop.eup %503  ;;  %vm326_vm4 = vcmp.eq.s32.totalorder %v820_v19, %v316_v59  ;;  %v335_v27 = vsel %vm68_vm0, %v329_v15, 0.0 }
  0xe6   :  { %154 = vadd.xlane.f32.xlu0 %v153_v36  ;;  %280 = vadd.xlane.f32.xlu1 %v279_v43  ;;  %v506_v50 = vpop.eup %505  ;;  %v213_v51 = vsel %vm68_vm0, %v504_v44, 0.0  ;;  %v183_v24 = vsel %vm68_vm0, %v173_v20, 0.0  ;;  %v332_v25 = vsel %vm326_vm4, %v724_v3, 0.0 }
  0xe7   :  { %v508_v52 = vpop.eup %507  ;;  %v147_v61 = vsel %vm68_vm0, %v506_v50, 0.0  ;;  %v171_v12 = vmul.f32 %v506_v50, %v165_v5  ;;  %v344_v29 = vsel %vm68_vm0, %v332_v25, 0.0 }
  0xe8   :  { %v510_v6 = vpop.eup %509  ;;  %v225_v60 = vsel %vm68_vm0, %v508_v52, 0.0  ;;  %v319_v33 = vpop.permute.xlu1 %318 }
  0xe9   :  { %v159_v23 = vsel %vm68_vm0, %v510_v6, 0.0  ;;  %v512_v62 = vpop.eup %511  ;;  %v177_v16 = vsel %vm68_vm0, %v171_v12, 0.0  ;;  %v175_v3 = vmul.f32 %v510_v6, %v169_v2  ;;  %vm327_vm5 = vcmp.eq.s32.totalorder %v820_v19, %v319_v33 }
  0xea   :  { %339 = vadd.xlane.f32.xlu0 %v338_v46  ;;  %214 = vadd.xlane.f32.xlu1 %v213_v51  ;;  %v150_v0 = vsel %vm68_vm0, %v512_v62, 0.0  ;;  %v514_v4 = vpop.eup %513  ;;  %v172_v30 = vmul.f32 %v512_v62, %v166_v22  ;;  %v333_v35 = vsel %vm327_vm5, %v744_v17, 0.0 }
  0xeb   :  { %v219_v10 = vsel %vm68_vm0, %v514_v4, 0.0  ;;  %v516_v13 = vpop.eup %515  ;;  %v189_v28 = vsel %vm68_vm0, %v175_v3, 0.0  ;;  %v347_v36 = vsel %vm68_vm0, %v333_v35, 0.0 }
  0xec   :  { %v222_v18 = vsel %vm68_vm0, %v516_v13, 0.0  ;;  %v518_v48 = vpop.eup %517  ;;  %v180_v37 = vsel %vm68_vm0, %v172_v30, 0.0 }
  0xed   :  { %v156_v55 = vsel %vm68_vm0, %v518_v48, 0.0  ;;  %v174_v21 = vmul.f32 %v518_v48, %v168_v11 }
  0xee   :  { %226 = vadd.xlane.f32.xlu0 %v225_v60  ;;  %148 = vadd.xlane.f32.xlu1 %v147_v61 }
  0xef   :  { %v186_v34 = vsel %vm68_vm0, %v174_v21, 0.0 }
  0xf2   :  { %160 = vadd.xlane.f32.xlu0 %v159_v23  ;;  %151 = vadd.xlane.f32.xlu1 %v150_v0 }
  0xf6   :  { %342 = vadd.xlane.f32.xlu0 %v341_v7  ;;  %220 = vadd.xlane.f32.xlu1 %v219_v10 }
  0xfa   :  { %178 = vadd.xlane.f32.xlu0 %v177_v16  ;;  %223 = vadd.xlane.f32.xlu1 %v222_v18 }
  0xfe   :  { %184 = vadd.xlane.f32.xlu0 %v183_v24  ;;  %157 = vadd.xlane.f32.xlu1 %v156_v55 }
 0x102   :  { %345 = vadd.xlane.f32.xlu0 %v344_v29  ;;  %336 = vadd.xlane.f32.xlu1 %v335_v27 }
 0x106   :  { %181 = vadd.xlane.f32.xlu1 %v180_v37 }
 0x10a   :  { %187 = vadd.xlane.f32.xlu1 %v186_v34 }
 0x10e   :  { %190 = vadd.xlane.f32.xlu1 %v189_v28 }
 0x112   :  { %348 = vadd.xlane.f32.xlu1 %v347_v36 }
 0x167   :  { %v269_v54 = vpop.xlane.xlu0 %268 }
 0x16b   :  { %v272_v8 = vpop.xlane.xlu1 %271  ;;  %v275_v40 = vpop.xlane.xlu0 %274 }
 0x16f   :  { %v278_v42 = vpop.xlane.xlu1 %277  ;;  %v218_v43 = vpop.xlane.xlu0 %217 }
 0x173   :  { %v281_v44 = vpop.xlane.xlu1 %280  ;;  %v155_v46 = vpop.xlane.xlu0 %154 }
 0x177   :  { %v215_v47 = vpop.xlane.xlu1 %214  ;;  %v879_v49 = vpop.xlane.xlu0 %339 }
 0x178   :  { %519 = vlog2.f32 %v215_v47 }
 0x179   :  { %521 = vlog2.f32 %v269_v54 }
 0x17a   :  { %523 = vlog2.f32 %v272_v8 }
 0x17b   :  { %v149_v19 = vpop.xlane.xlu1 %148  ;;  %v227_v50 = vpop.xlane.xlu0 %226 }
 0x17c   :  { %525 = vlog2.f32 %v149_v19 }
 0x17d   :  { %527 = vlog2.f32 %v275_v40 }
 0x17e   :  { %529 = vrcp.f32 %v149_v19 }
 0x17f   :  { %v152_v17 = vpop.xlane.xlu1 %151  ;;  %v161_v51 = vpop.xlane.xlu0 %160  ;;  %531 = vlog2.f32 %v218_v43 }
 0x180   :  { %533 = vlog2.f32 %v155_v46 }
 0x181   :  { %535 = vlog2.f32 %v152_v17 }
 0x182   :  { %v520_v6 = vpop.eup %519 }
 0x183   :  { %v221_v52 = vpop.xlane.xlu1 %220  ;;  %v881_v57 = vpop.xlane.xlu0 %342  ;;  %v232_v23 = vmul.f32 0.6931472, %v520_v6 }
 0x184   :  { %537 = vlog2.f32 %v221_v52  ;;  %v522_v58 = vpop.eup %521 }
 0x185   :  { %539 = vlog2.f32 %v278_v42  ;;  %v524_v60 = vpop.eup %523  ;;  %v286_v5 = vmul.f32 0.6931472, %v522_v58  ;;  %v243_v12 = vadd.f32 %v232_v23, %v782_v45 }
 0x186   :  { %541 = vrcp.f32 %v155_v46  ;;  %v526_v61 = vpop.eup %525  ;;  %v288_v7 = vmul.f32 0.6931472, %v524_v60 }
 0x187   :  { %543 = vlog2.f32 %v227_v50  ;;  %v224_v62 = vpop.xlane.xlu1 %223  ;;  %v528_v63 = vpop.eup %527  ;;  %v366_v0 = vmul.f32 0.6931472, %v526_v61  ;;  %v297_v15 = vadd.f32 %v286_v5, %v759_v32 }
 0x188   :  { %545 = vlog2.f32 %v224_v62  ;;  %v530_v4 = vpop.eup %529  ;;  %v179_v9 = vpop.xlane.xlu0 %178  ;;  %v298_v55 = vadd.f32 %v288_v7, %v770_v39  ;;  %v290_v11 = vmul.f32 0.6931472, %v528_v63 }
 0x189   :  { %547 = vrcp.f32 %v152_v17  ;;  %v532_v10 = vpop.eup %531  ;;  %v377_v18 = vsub.f32 %v243_v12, %v366_v0  ;;  %v354_v20 = vmul.f32 %v530_v4, %v179_v9 }
 0x18a   :  { %549 = vlog2.f32 %v161_v51  ;;  %v534_v1 = vpop.eup %533  ;;  %v234_v59 = vmul.f32 0.6931472, %v532_v10  ;;  %v390_v32 = vsub.f32 %v298_v55, %v879_v49  ;;  %v299_v43 = vadd.f32 %v290_v11, %v757_v31 }
 0x18b   :  { %551 = vlog2.f32 %v281_v44  ;;  %v158_v13 = vpop.xlane.xlu1 %157  ;;  %v536_v16 = vpop.eup %535  ;;  %v370_v37 = vmul.f32 0.6931472, %v534_v1  ;;  %v383_v33 = vadd.f32 %v377_v18, %v354_v20 }
 0x18c   :  { %553 = vrcp.f32 %v158_v13  ;;  %v368_v29 = vmul.f32 0.6931472, %v536_v16  ;;  %v185_v45 = vpop.xlane.xlu0 %184  ;;  %v244_v39 = vadd.f32 %v234_v59, %v775_v41  ;;  %v391_v41 = vsub.f32 %v299_v43, %v881_v57 }
 0x18d   :  { %555 = vlog2.f32 %v158_v13  ;;  %v395_v19 = vmul.f32 4.5, %v383_v33 }
 0x18e   :  { %v538_v48 = vpop.eup %537  ;;  %557 = vrcp.f32 %v161_v51  ;;  %v378_v46 = vsub.f32 %v244_v39, %v368_v29  ;;  %v402_v51 = vmul.f32 0.5, %v390_v32  ;;  %v403_v9 = vmul.f32 0.5, %v391_v41 }
 0x18f   :  { %v540_v22 = vpop.eup %539  ;;  %v236_v24 = vmul.f32 0.6931472, %v538_v48  ;;  %v337_v25 = vpop.xlane.xlu1 %336 }
 0x190   :  { %v542_v27 = vpop.eup %541  ;;  %v389_v30 = vsub.f32 %v297_v15, %v337_v25  ;;  %v292_v3 = vmul.f32 0.6931472, %v540_v22  ;;  %v346_v31 = vpop.xlane.xlu0 %345 }
 0x191   :  { %v544_v2 = vpop.eup %543  ;;  %v245_v21 = vadd.f32 %v236_v24, %v814_v14  ;;  %v358_v54 = vmul.f32 %v542_v27, %v185_v45 }
 0x192   :  { %v546_v34 = vpop.eup %545  ;;  %v401_v8 = vmul.f32 0.5, %v389_v30  ;;  %v240_v14 = vmul.f32 0.6931472, %v544_v2  ;;  %v300_v61 = vadd.f32 %v292_v3, %v768_v38 }
 0x193   :  { %v548_v28 = vpop.eup %547  ;;  %v238_v35 = vmul.f32 0.6931472, %v546_v34  ;;  %v379_v36 = vsub.f32 %v245_v21, %v370_v37  ;;  %v182_v40 = vpop.xlane.xlu1 %181 }
 0x194   :  { %v550_v42 = vpop.eup %549  ;;  %v356_v44 = vmul.f32 %v548_v28, %v182_v40  ;;  %v407_v60 = vadd.f32 %v401_v8, %v395_v19  ;;  %v247_v7 = vadd.f32 %v240_v14, %v797_v56  ;;  %v392_v57 = vsub.f32 %v300_v61, %v346_v31 }
 0x195   :  { %v552_v47 = vpop.eup %551  ;;  %v385_v50 = vadd.f32 %v379_v36, %v358_v54  ;;  %v374_v6 = vmul.f32 0.6931472, %v550_v42  ;;  %v246_v58 = vadd.f32 %v238_v35, %v828_v26 }
 0x196   :  { %v554_v17 = vpop.eup %553  ;;  %v384_v49 = vadd.f32 %v378_v46, %v356_v44  ;;  %v294_v5 = vmul.f32 0.6931472, %v552_v47  ;;  %v441_v1 = vsel %vm440_vm6, %v407_v60, 0.0  ;;  %v404_v55 = vmul.f32 0.5, %v392_v57 }
 0x197   :  { %v556_v52 = vpop.eup %555  ;;  %v188_v23 = vpop.xlane.xlu1 %187  ;;  %v397_v63 = vmul.f32 4.5, %v385_v50  ;;  %v381_v16 = vsub.f32 %v247_v7, %v374_v6 }
 0x198   :  { %v372_v62 = vmul.f32 0.6931472, %v556_v52  ;;  %v396_v0 = vmul.f32 4.5, %v384_v49  ;;  %v360_v4 = vmul.f32 %v554_v17, %v188_v23  ;;  %v558_v13 = vpop.eup %557  ;;  %v301_v56 = vadd.f32 %v294_v5, %v789_v53 }
 0x199   :  { %v409_v18 = vadd.f32 %v403_v9, %v397_v63 }
 0x19a   :  { %v408_v10 = vadd.f32 %v402_v51, %v396_v0  ;;  %v380_v12 = vsub.f32 %v246_v58, %v372_v62 }
 0x19b   :  { %v191_v26 = vpop.xlane.xlu1 %190  ;;  %v444_v11 = vsel %vm440_vm6, %v409_v18, 0.0 }
 0x19c   :  { %v442_v38 = vsel %vm440_vm6, %v408_v10, 0.0  ;;  %v386_v20 = vadd.f32 %v380_v12, %v360_v4  ;;  %v362_v48 = vmul.f32 %v558_v13, %v191_v26 }
 0x19d   :  { %v443_v59 = vadd.f32 %v442_v38, %v441_v1 }
 0x19e   :  { %v398_v15 = vmul.f32 4.5, %v386_v20  ;;  %v387_v22 = vadd.f32 %v381_v16, %v362_v48 }
 0x19f   :  { %v349_v24 = vpop.xlane.xlu1 %348  ;;  %v445_v29 = vadd.f32 %v444_v11, %v443_v59 }
 0x1a0   :  { %v410_v25 = vadd.f32 %v404_v55, %v398_v15  ;;  %v393_v27 = vsub.f32 %v301_v56, %v349_v24  ;;  %v399_v45 = vmul.f32 4.5, %v387_v22 }
 0x1a2   :  { %v405_v30 = vmul.f32 0.5, %v393_v27  ;;  %v446_v2 = vsel %vm440_vm6, %v410_v25, 0.0 }
 0x1a3   :  { %v447_v21 = vadd.f32 %v446_v2, %v445_v29 }
 0x1a4   :  { %v411_v37 = vadd.f32 %v405_v30, %v399_v45 }
 0x1a6   :  { %v448_v33 = vsel %vm440_vm6, %v411_v37, 0.0 }
 0x1a7   :  { %v449_v34 = vadd.f32 %v448_v33, %v447_v21 }
 0x1a9   :  { %452 = vadd.xlane.f32.xlu0 %v449_v34 }
 0x236   :  { %v453_v3 = vpop.xlane.xlu0 %452 }
 0x237   :  { %v454_v39 = vrot.slane %v453_v3, 4 }
 0x239   :  { %v455_v32 = vadd.f32 %v454_v39, %v453_v3 }
 0x23b   :  { %v456_v53 = vrot.slane %v455_v32, 2 }
 0x23d   :  { %v457_v28 = vadd.f32 %v456_v53, %v455_v32 }
 0x23f   :  { %v458_v35 = vrot.slane %v457_v28, 1 }
 0x241   :  { %v459_v36 = vadd.f32 %v458_v35, %v457_v28 }
 0x243   :  { %478 = vpush %v459_v36 }
 0x274   :  { %s479_s2 = spop %478 }
 0x275   :  { %462 = sst [smem:[#allocation8]] %s479_s2 }
 0x276   :  { %634 = shalt.err (!%p631_p12)
}
 0x277   :  { %s647_s30 = smov [#allocation8]  }
 0x278   :  { %470 = dma.smem_to_hbm %s647_s30, 16, %s915_s3, [#allocation4]  }
 0x279   :  { %639 = dma.done.wait [#allocation4], 16  }
 0x27a   :  { %640 = vsyncadd [#allocation4], 4294967280 }
 0x27b   :  { %474 = sfence }
 0x27c   :  { %475 = vsyncpa [#allocation3], 1 }
 0x27d   :  { %476 = vsyncpa [#allocation6], 1 }
 0x27e   :  { %477 = vsyncpa [#allocation4], 1 }

</bundles_post_ra>
